<compile_context>
chip_gen: v7x
topology: tpu7x:2x2x1
jax: 0.10.0
libtpu: 0.0.40
codegen_flags: <defaults>
</compile_context>

<pallas_src>
import functools

import jax
import jax.numpy as jnp
import numpy as np
from jax import lax
from jax.experimental import pallas as pl
from jax.experimental.pallas import tpu as pltpu


def _conv_kernel(x_ref, w_ref, o_ref, xpad_ref, col_ref, *,
                 kH, kW, stride, pad, H, W, TH, Wo, Cin):
    """One (batch, row-tile) per grid step.

    x_ref:    (1, Cin, H, W)       full NCHW image, resident across row tiles
    w_ref:    (Cout, kH*kW*Cin)    im2col weights (Cout-major, f32)
    o_ref:    (1, Cout, TH*Wo)     lane-dense output tile (output rows t*TH .. t*TH+TH-1)
    xpad_ref: (Cin, TIN, Wp)       zero-padded input rows for this tile (f32 scratch)
    col_ref:  (kH*kW*Cin, TH*Wo)   im2col patch matrix, K on sublanes (f32 scratch)
    """
    t = pl.program_id(1)
    M = (TH - 1) * stride + 1                 # interior input rows needed per tile
    TIN = M + 2 * pad
    Wp = W + 2 * pad
    p0 = pl.multiple_of(t * (TH * stride), TH * stride)   # first interior row (unpadded)

    # ---- stage 1: zero-padded input rows (only the pad border is zeroed) -----------
    if pad > 0:
        xpad_ref[:, 0:pad, :] = jnp.zeros((Cin, pad, Wp), xpad_ref.dtype)
        xpad_ref[:, pad + M:, :] = jnp.zeros((Cin, pad, Wp), xpad_ref.dtype)
        xpad_ref[:, :, 0:pad] = jnp.zeros((Cin, TIN, pad), xpad_ref.dtype)
        xpad_ref[:, :, pad + W:] = jnp.zeros((Cin, TIN, pad), xpad_ref.dtype)

    # Interior rows are always in range for every tile.
    xpad_ref[:, pad:pad + M, pad:pad + W] = x_ref[0, :, pl.ds(p0, M), :]

    # Halo rows above / below this tile (stay zero when outside the image).
    for j in range(pad):
        top_src = p0 - pad + j
        bot_src = p0 + M + j

        @pl.when(top_src >= 0)
        def _(top_src=top_src, j=j):
            xpad_ref[:, j:j + 1, pad:pad + W] = x_ref[0, :, pl.ds(top_src, 1), :]

        @pl.when(bot_src < H)
        def _(bot_src=bot_src, j=j):
            xpad_ref[:, pad + M + j:pad + M + j + 1, pad:pad + W] = (
                x_ref[0, :, pl.ds(bot_src, 1), :])

    # ---- stage 2: im2col, transposed layout (K on sublanes, spatial lane-dense) ----
    xp = xpad_ref[...]                                      # (Cin, TIN, Wp)
    for ki in range(kH):
        for kj in range(kW):
            piece = xp[:, ki:ki + (TH - 1) * stride + 1:stride,
                          kj:kj + (Wo - 1) * stride + 1:stride]   # (Cin, TH, Wo)
            c0 = (ki * kW + kj) * Cin
            col_ref[c0:c0 + Cin, :] = piece.reshape(Cin, TH * Wo)

    # ---- stage 3: one MXU matmul, result lane-dense at birth (no transpose) --------
    acc = jnp.dot(w_ref[...], col_ref[...],
                  preferred_element_type=jnp.float32)       # (Cout, TH*Wo) f32
    o_ref[0] = acc.astype(o_ref.dtype)


def _pick_row_tile(Ho, Wo, max_lanes=4096):
    """Row-tile height: divides Ho, lane-aligned output (TH*Wo % 128 == 0), modest size,
    and (when possible) >= 2 tiles so both v7x TensorCores get work even at N == 1."""
    aligned = [c for c in range(1, Ho + 1)
               if Ho % c == 0 and (c * Wo) % 128 == 0 and c * Wo <= max_lanes]
    multi = [c for c in aligned if c < Ho]
    if multi:
        return max(multi)
    if aligned:
        return max(aligned)
    # TODO(synk): this fallback loses 128-lane output alignment (masked stores);
    #             pad Wo to a multiple of 128 upstream for such shapes.
    divs = [c for c in range(1, Ho) if Ho % c == 0 and c * Wo <= max_lanes]
    return max(divs) if divs else Ho


def conv2d_same(x_nchw, weight_oihw, *, stride=1):
    """nn.Conv2d(nIn, nOut, (k, k), stride=stride, padding=((k-1)//2,)*2, bias=False)."""
    N, Cin, H, W = x_nchw.shape
    Cout, Cin_w, kH, kW = weight_oihw.shape
    assert Cin == Cin_w and kH == kW, "square kernels only (as in TwinLite)"
    pad = (kH - 1) // 2
    Ho = (H + 2 * pad - kH) // stride + 1
    Wo = (W + 2 * pad - kW) // stride + 1
    K = kH * kW * Cin

    TH = _pick_row_tile(Ho, Wo)
    T = Ho // TH
    M = (TH - 1) * stride + 1
    TIN = M + 2 * pad
    Wp = W + 2 * pad

    # OIHW -> (Cout, kH*kW*Cin): k ordered (ki, kj, ci) to match the im2col row layout.
    w2 = jnp.transpose(weight_oihw, (0, 2, 3, 1)).reshape(Cout, K).astype(x_nchw.dtype)

    kernel = functools.partial(_conv_kernel, kH=kH, kW=kW, stride=stride, pad=pad,
                               H=H, W=W, TH=TH, Wo=Wo, Cin=Cin)

    out = pl.pallas_call(
        kernel,
        out_shape=jax.ShapeDtypeStruct((N, Cout, Ho * Wo), x_nchw.dtype),
        grid=(N, T),
        in_specs=[
            pl.BlockSpec((1, Cin, H, W), lambda n, t: (n, 0, 0, 0)),
            pl.BlockSpec((Cout, K), lambda n, t: (0, 0)),
        ],
        out_specs=pl.BlockSpec((1, Cout, TH * Wo), lambda n, t: (n, 0, t)),
        scratch_shapes=[
            pltpu.VMEM((Cin, TIN, Wp), x_nchw.dtype),      # padded input rows
            pltpu.VMEM((K, TH * Wo), x_nchw.dtype),        # im2col patch matrix
        ],
        compiler_params=pltpu.CompilerParams(
            dimension_semantics=("parallel", "parallel")),
    )(x_nchw, w2)

    # (N, Cout, Ho*Wo) -> (N, Cout, Ho, Wo): contiguous, free reshape.
    return out.reshape(N, Cout, Ho, Wo)


if __name__ == "__main__":
    # C(nIn=4, nOut=8, kSize=3, stride=1) on a (2, 4, 16, 16) input.
    N, Cin, H, W = 2, 4, 16, 16
    Cout, kSize, stride = 8, 3, 1

    key = jax.random.PRNGKey(0)
    kx, kw = jax.random.split(key, 2)
    x = jax.random.normal(kx, (N, Cin, H, W), jnp.float32)
    weight = jax.random.normal(kw, (Cout, Cin, kSize, kSize), jnp.float32) * 0.1

    out = conv2d_same(x, weight, stride=stride)
    out = jax.block_until_ready(out)

    pad = (kSize - 1) // 2
    ref = lax.conv_general_dilated(
        x, weight, window_strides=(stride, stride),
        padding=((pad, pad), (pad, pad)),
        dimension_numbers=("NCHW", "OIHW", "NCHW"))

    assert out.shape == (N, Cout, H // stride, W // stride)
    err = np.max(np.abs(np.asarray(out, np.float32) - np.asarray(ref, np.float32)))
    assert err < 2e-2, f"max abs err {err}"
    print("KERNEL_OK")
</pallas_src>

<mosaic_0001>
module attributes {stable_mosaic.version = 11 : i64} {
  func.func @_conv_kernel(%arg0: i32, %arg1: i32, %arg2: memref<1x4x16x16xf32, #tpu.memory_space<vmem>>, %arg3: memref<8x36xf32, #tpu.memory_space<vmem>>, %arg4: memref<1x8x128xf32, #tpu.memory_space<vmem>>, %arg5: memref<4x10x18xf32, #tpu.memory_space<vmem>>, %arg6: memref<36x128xf32, #tpu.memory_space<vmem>>) attributes {dimension_semantics = [#tpu.dimension_semantics<parallel>, #tpu.dimension_semantics<parallel>], iteration_bounds = array<i64: 2, 2>, scalar_prefetch = 0 : i64, scratch_operands = 2 : i64, tpu.core_type = #tpu.core_type<tc>, window_params = [{transform_indices = @transform_0, window_bounds = array<i64: 1, 4, 16, 16>}, {pipeline_mode = #tpu.pipeline_mode<synchronous>, transform_indices = @transform_1, window_bounds = array<i64: 8, 36>}, {transform_indices = @transform_2, window_bounds = array<i64: 1, 8, 128>}]} {
    %c8_i32 = arith.constant 8 : i32
    %0 = arith.muli %arg1, %c8_i32 : i32
    %1 = tpu.assume_multiple %0, 8 : i32
    %cst = arith.constant 0.000000e+00 : f32
    %2 = vector.broadcast %cst : f32 to vector<4x1x18xf32>
    %c0 = arith.constant 0 : index
    %c0_0 = arith.constant 0 : index
    %c0_1 = arith.constant 0 : index
    %3 = vector.load %arg5[%c0, %c0_0, %c0_1] : memref<4x10x18xf32, #tpu.memory_space<vmem>>, vector<4x1x18xf32>
    tpu.vector_store %arg5[%c0, %c0_0, %c0_1], %2 {strides = array<i32>} : memref<4x10x18xf32, #tpu.memory_space<vmem>>, vector<4x1x18xf32>,
    %cst_2 = arith.constant 0.000000e+00 : f32
    %4 = vector.broadcast %cst_2 : f32 to vector<4x1x18xf32>
    %c0_3 = arith.constant 0 : index
    %c9 = arith.constant 9 : index
    %c0_4 = arith.constant 0 : index
    %5 = vector.load %arg5[%c0_3, %c9, %c0_4] : memref<4x10x18xf32, #tpu.memory_space<vmem>>, vector<4x1x18xf32>
    tpu.vector_store %arg5[%c0_3, %c9, %c0_4], %4 {strides = array<i32>} : memref<4x10x18xf32, #tpu.memory_space<vmem>>, vector<4x1x18xf32>,
    %cst_5 = arith.constant 0.000000e+00 : f32
    %6 = vector.broadcast %cst_5 : f32 to vector<4x10x1xf32>
    %c0_6 = arith.constant 0 : index
    %c0_7 = arith.constant 0 : index
    %c0_8 = arith.constant 0 : index
    %7 = vector.load %arg5[%c0_6, %c0_7, %c0_8] : memref<4x10x18xf32, #tpu.memory_space<vmem>>, vector<4x10x1xf32>
    tpu.vector_store %arg5[%c0_6, %c0_7, %c0_8], %6 {strides = array<i32>} : memref<4x10x18xf32, #tpu.memory_space<vmem>>, vector<4x10x1xf32>,
    %cst_9 = arith.constant 0.000000e+00 : f32
    %8 = vector.broadcast %cst_9 : f32 to vector<4x10x1xf32>
    %c0_10 = arith.constant 0 : index
    %c0_11 = arith.constant 0 : index
    %c17 = arith.constant 17 : index
    %9 = vector.load %arg5[%c0_10, %c0_11, %c17] : memref<4x10x18xf32, #tpu.memory_space<vmem>>, vector<4x10x1xf32>
    tpu.vector_store %arg5[%c0_10, %c0_11, %c17], %8 {strides = array<i32>} : memref<4x10x18xf32, #tpu.memory_space<vmem>>, vector<4x10x1xf32>,
    %c0_12 = arith.constant 0 : index
    %c0_13 = arith.constant 0 : index
    %10 = arith.index_cast %1 : i32 to index
    %c0_14 = arith.constant 0 : index
    %11 = vector.load %arg2[%c0_12, %c0_13, %10, %c0_14] : memref<1x4x16x16xf32, #tpu.memory_space<vmem>>, vector<1x4x8x16xf32>
    %12 = vector.shape_cast %11 : vector<1x4x8x16xf32> to vector<4x8x16xf32>
    %c0_15 = arith.constant 0 : index
    %c1 = arith.constant 1 : index
    %c1_16 = arith.constant 1 : index
    %13 = vector.load %arg5[%c0_15, %c1, %c1_16] : memref<4x10x18xf32, #tpu.memory_space<vmem>>, vector<4x8x16xf32>
    tpu.vector_store %arg5[%c0_15, %c1, %c1_16], %12 {strides = array<i32>} : memref<4x10x18xf32, #tpu.memory_space<vmem>>, vector<4x8x16xf32>,
    %c1_i32 = arith.constant 1 : i32
    %14 = arith.subi %1, %c1_i32 : i32
    %c0_i32 = arith.constant 0 : i32
    %15 = arith.addi %14, %c0_i32 : i32
    %c8_i32_17 = arith.constant 8 : i32
    %16 = arith.addi %1, %c8_i32_17 : i32
    %c0_i32_18 = arith.constant 0 : i32
    %17 = arith.addi %16, %c0_i32_18 : i32
    %c0_i32_19 = arith.constant 0 : i32
    %18 = arith.cmpi sge, %15, %c0_i32_19 : i32
    %19 = arith.extui %18 : i1 to i32
    %c0_i32_20 = arith.constant 0 : i32
    %20 = arith.cmpi ne, %19, %c0_i32_20 : i32
    scf.if %20 {
      %c0_43 = arith.constant 0 : index
      %c0_44 = arith.constant 0 : index
      %58 = arith.index_cast %15 : i32 to index
      %c0_45 = arith.constant 0 : index
      %59 = vector.load %arg2[%c0_43, %c0_44, %58, %c0_45] : memref<1x4x16x16xf32, #tpu.memory_space<vmem>>, vector<1x4x1x16xf32>
      %60 = vector.shape_cast %59 : vector<1x4x1x16xf32> to vector<4x1x16xf32>
      %c0_46 = arith.constant 0 : index
      %c0_47 = arith.constant 0 : index
      %c1_48 = arith.constant 1 : index
      %61 = vector.load %arg5[%c0_46, %c0_47, %c1_48] : memref<4x10x18xf32, #tpu.memory_space<vmem>>, vector<4x1x16xf32>
      tpu.vector_store %arg5[%c0_46, %c0_47, %c1_48], %60 {strides = array<i32>} : memref<4x10x18xf32, #tpu.memory_space<vmem>>, vector<4x1x16xf32>,
    } else {
    }
    %c16_i32 = arith.constant 16 : i32
    %21 = arith.cmpi slt, %17, %c16_i32 : i32
    %22 = arith.extui %21 : i1 to i32
    %c0_i32_21 = arith.constant 0 : i32
    %23 = arith.cmpi ne, %22, %c0_i32_21 : i32
    scf.if %23 {
      %c0_43 = arith.constant 0 : index
      %c0_44 = arith.constant 0 : index
      %58 = arith.index_cast %17 : i32 to index
      %c0_45 = arith.constant 0 : index
      %59 = vector.load %arg2[%c0_43, %c0_44, %58, %c0_45] : memref<1x4x16x16xf32, #tpu.memory_space<vmem>>, vector<1x4x1x16xf32>
      %60 = vector.shape_cast %59 : vector<1x4x1x16xf32> to vector<4x1x16xf32>
      %c0_46 = arith.constant 0 : index
      %c9_47 = arith.constant 9 : index
      %c1_48 = arith.constant 1 : index
      %61 = vector.load %arg5[%c0_46, %c9_47, %c1_48] : memref<4x10x18xf32, #tpu.memory_space<vmem>>, vector<4x1x16xf32>
      tpu.vector_store %arg5[%c0_46, %c9_47, %c1_48], %60 {strides = array<i32>} : memref<4x10x18xf32, #tpu.memory_space<vmem>>, vector<4x1x16xf32>,
    } else {
    }
    %c0_22 = arith.constant 0 : index
    %c0_23 = arith.constant 0 : index
    %c0_24 = arith.constant 0 : index
    %24 = vector.load %arg5[%c0_22, %c0_23, %c0_24] : memref<4x10x18xf32, #tpu.memory_space<vmem>>, vector<4x10x18xf32>
    %25 = vector.extract_strided_slice %24 {offsets = [0, 0, 0], sizes = [4, 8, 16], strides = [1, 1, 1]} : vector<4x10x18xf32> to vector<4x8x16xf32>
    %26 = vector.shape_cast %25 : vector<4x8x16xf32> to vector<4x128xf32>
    %c0_25 = arith.constant 0 : index
    %c0_26 = arith.constant 0 : index
    %27 = vector.load %arg6[%c0_25, %c0_26] : memref<36x128xf32, #tpu.memory_space<vmem>>, vector<4x128xf32>
    tpu.vector_store %arg6[%c0_25, %c0_26], %26 {strides = array<i32>} : memref<36x128xf32, #tpu.memory_space<vmem>>, vector<4x128xf32>,
    %28 = vector.extract_strided_slice %24 {offsets = [0, 0, 1], sizes = [4, 8, 16], strides = [1, 1, 1]} : vector<4x10x18xf32> to vector<4x8x16xf32>
    %29 = vector.shape_cast %28 : vector<4x8x16xf32> to vector<4x128xf32>
    %c4 = arith.constant 4 : index
    %c0_27 = arith.constant 0 : index
    %30 = vector.load %arg6[%c4, %c0_27] : memref<36x128xf32, #tpu.memory_space<vmem>>, vector<4x128xf32>
    tpu.vector_store %arg6[%c4, %c0_27], %29 {strides = array<i32>} : memref<36x128xf32, #tpu.memory_space<vmem>>, vector<4x128xf32>,
    %31 = vector.extract_strided_slice %24 {offsets = [0, 0, 2], sizes = [4, 8, 16], strides = [1, 1, 1]} : vector<4x10x18xf32> to vector<4x8x16xf32>
    %32 = vector.shape_cast %31 : vector<4x8x16xf32> to vector<4x128xf32>
    %c8 = arith.constant 8 : index
    %c0_28 = arith.constant 0 : index
    %33 = vector.load %arg6[%c8, %c0_28] : memref<36x128xf32, #tpu.memory_space<vmem>>, vector<4x128xf32>
    tpu.vector_store %arg6[%c8, %c0_28], %32 {strides = array<i32>} : memref<36x128xf32, #tpu.memory_space<vmem>>, vector<4x128xf32>,
    %34 = vector.extract_strided_slice %24 {offsets = [0, 1, 0], sizes = [4, 8, 16], strides = [1, 1, 1]} : vector<4x10x18xf32> to vector<4x8x16xf32>
    %35 = vector.shape_cast %34 : vector<4x8x16xf32> to vector<4x128xf32>
    %c12 = arith.constant 12 : index
    %c0_29 = arith.constant 0 : index
    %36 = vector.load %arg6[%c12, %c0_29] : memref<36x128xf32, #tpu.memory_space<vmem>>, vector<4x128xf32>
    tpu.vector_store %arg6[%c12, %c0_29], %35 {strides = array<i32>} : memref<36x128xf32, #tpu.memory_space<vmem>>, vector<4x128xf32>,
    %37 = vector.extract_strided_slice %24 {offsets = [0, 1, 1], sizes = [4, 8, 16], strides = [1, 1, 1]} : vector<4x10x18xf32> to vector<4x8x16xf32>
    %38 = vector.shape_cast %37 : vector<4x8x16xf32> to vector<4x128xf32>
    %c16 = arith.constant 16 : index
    %c0_30 = arith.constant 0 : index
    %39 = vector.load %arg6[%c16, %c0_30] : memref<36x128xf32, #tpu.memory_space<vmem>>, vector<4x128xf32>
    tpu.vector_store %arg6[%c16, %c0_30], %38 {strides = array<i32>} : memref<36x128xf32, #tpu.memory_space<vmem>>, vector<4x128xf32>,
    %40 = vector.extract_strided_slice %24 {offsets = [0, 1, 2], sizes = [4, 8, 16], strides = [1, 1, 1]} : vector<4x10x18xf32> to vector<4x8x16xf32>
    %41 = vector.shape_cast %40 : vector<4x8x16xf32> to vector<4x128xf32>
    %c20 = arith.constant 20 : index
    %c0_31 = arith.constant 0 : index
    %42 = vector.load %arg6[%c20, %c0_31] : memref<36x128xf32, #tpu.memory_space<vmem>>, vector<4x128xf32>
    tpu.vector_store %arg6[%c20, %c0_31], %41 {strides = array<i32>} : memref<36x128xf32, #tpu.memory_space<vmem>>, vector<4x128xf32>,
    %43 = vector.extract_strided_slice %24 {offsets = [0, 2, 0], sizes = [4, 8, 16], strides = [1, 1, 1]} : vector<4x10x18xf32> to vector<4x8x16xf32>
    %44 = vector.shape_cast %43 : vector<4x8x16xf32> to vector<4x128xf32>
    %c24 = arith.constant 24 : index
    %c0_32 = arith.constant 0 : index
    %45 = vector.load %arg6[%c24, %c0_32] : memref<36x128xf32, #tpu.memory_space<vmem>>, vector<4x128xf32>
    tpu.vector_store %arg6[%c24, %c0_32], %44 {strides = array<i32>} : memref<36x128xf32, #tpu.memory_space<vmem>>, vector<4x128xf32>,
    %46 = vector.extract_strided_slice %24 {offsets = [0, 2, 1], sizes = [4, 8, 16], strides = [1, 1, 1]} : vector<4x10x18xf32> to vector<4x8x16xf32>
    %47 = vector.shape_cast %46 : vector<4x8x16xf32> to vector<4x128xf32>
    %c28 = arith.constant 28 : index
    %c0_33 = arith.constant 0 : index
    %48 = vector.load %arg6[%c28, %c0_33] : memref<36x128xf32, #tpu.memory_space<vmem>>, vector<4x128xf32>
    tpu.vector_store %arg6[%c28, %c0_33], %47 {strides = array<i32>} : memref<36x128xf32, #tpu.memory_space<vmem>>, vector<4x128xf32>,
    %49 = vector.extract_strided_slice %24 {offsets = [0, 2, 2], sizes = [4, 8, 16], strides = [1, 1, 1]} : vector<4x10x18xf32> to vector<4x8x16xf32>
    %50 = vector.shape_cast %49 : vector<4x8x16xf32> to vector<4x128xf32>
    %c32 = arith.constant 32 : index
    %c0_34 = arith.constant 0 : index
    %51 = vector.load %arg6[%c32, %c0_34] : memref<36x128xf32, #tpu.memory_space<vmem>>, vector<4x128xf32>
    tpu.vector_store %arg6[%c32, %c0_34], %50 {strides = array<i32>} : memref<36x128xf32, #tpu.memory_space<vmem>>, vector<4x128xf32>,
    %c0_35 = arith.constant 0 : index
    %c0_36 = arith.constant 0 : index
    %52 = vector.load %arg3[%c0_35, %c0_36] : memref<8x36xf32, #tpu.memory_space<vmem>>, vector<8x36xf32>
    %c0_37 = arith.constant 0 : index
    %c0_38 = arith.constant 0 : index
    %53 = vector.load %arg6[%c0_37, %c0_38] : memref<36x128xf32, #tpu.memory_space<vmem>>, vector<36x128xf32>
    %cst_39 = arith.constant dense<0.000000e+00> : vector<8x128xf32>
    %54 = tpu.matmul %52, %53, %cst_39 {dimension_numbers = #tpu.dot_dimension_numbers<[1], [0], [0], [1], [0, 0, 1, 1], [], []>} : vector<8x36xf32>, vector<36x128xf32>, vector<8x128xf32> -> vector<8x128xf32>
    %c0_40 = arith.constant 0 : index
    %c0_41 = arith.constant 0 : index
    %c0_42 = arith.constant 0 : index
    %55 = vector.load %arg4[%c0_40, %c0_41, %c0_42] : memref<1x8x128xf32, #tpu.memory_space<vmem>>, vector<1x8x128xf32>
    %56 = vector.shape_cast %55 : vector<1x8x128xf32> to vector<8x128xf32>
    %57 = vector.shape_cast %54 : vector<8x128xf32> to vector<1x8x128xf32>
    tpu.vector_store %arg4[%c0_40, %c0_41, %c0_42], %57 {strides = array<i32>} : memref<1x8x128xf32, #tpu.memory_space<vmem>>, vector<1x8x128xf32>,
    return
  }
  func.func @transform_0(%arg0: i32, %arg1: i32) -> (i32, i32, i32, i32) {
    %c0_i32 = arith.constant 0 : i32
    %c0_i32_0 = arith.constant 0 : i32
    %c0_i32_1 = arith.constant 0 : i32
    %c0_i32_2 = arith.constant 0 : i32
    return %arg0, %c0_i32, %c0_i32_0, %c0_i32_1 : i32, i32, i32, i32
  }
  func.func @transform_1(%arg0: i32, %arg1: i32) -> (i32, i32) {
    %c0_i32 = arith.constant 0 : i32
    %c0_i32_0 = arith.constant 0 : i32
    %c0_i32_1 = arith.constant 0 : i32
    return %c0_i32, %c0_i32_0 : i32, i32
  }
  func.func @transform_2(%arg0: i32, %arg1: i32) -> (i32, i32, i32) {
    %c0_i32 = arith.constant 0 : i32
    %c0_i32_0 = arith.constant 0 : i32
    return %arg0, %c0_i32, %arg1 : i32, i32, i32
  }
}

</mosaic_0001>

<bundles_post_ra>
// kernel: tpu_custom_call.1
= control target key start
LH: loop header
LB: loop body
LE: loop exit
PB: predicated region body
PF: predicated region fallthrough
CT: control target
= control target key end

     0   :  { %s2775_s0 = inlined_call_operand.hbm [shape: f32[2,4,16,16], index: 0, kind: input, shape index: {}]   ;;  %s2776_s1 = inlined_call_operand.hbm [shape: f32[8,36], index: 1, kind: input, shape index: {}]   ;;  %s2777_s2 = inlined_call_operand.hbm [shape: f32[2,8,256], index: 2, kind: output, shape index: {}]  }
   0x1   :  { %2787 = sst [smem:[#allocation16_spill]] %s2776_s1 }
   0x2   :  { %7 = vsyncpa [#allocation5], 0 }
   0x3   :  { %9 = vsyncpa [#allocation5 + $0x1], 0 }
   0x4   :  { %10 = vsyncpa [#allocation8], 0 }
   0x5   :  { %11 = vsyncpa [#allocation6], 0 }
   0x6   :  { %13 = vsyncpa [#allocation6 + $0x1], 0  ;;  %s1981_s9 = smov 0   ;;  %s1983_s10 = smov 0  }
   0x7   :  { %s1985_s11 = smov 0   ;;  %s1987_s12 = smov 0  }
   0x8   :  { %s1989_s13 = smov 0   ;;  %s1991_s14 = smov 0  }
   0x9   :  { %s1993_s15 = smov 0   ;;  %s1995_s16 = smov 0  }
   0xa   :  { %s1997_s17 = smov 0   ;;  %s1999_s18 = smov 0  }
   0xb   :  { %s2001_s19 = smov 0  }
   0xc LB: > { %2788 = sst [smem:[#allocation13_spill]] %s1934_s17  ;;  %s1572_s20 = sadd.s32 4294967295, %s1942_s19   ;;  %s1942_s19 = sphi %s2001_s19, %s19_s19   ;;  %s1938_s18 = sphi %s1999_s18, %s2818_s18   ;;  %s1934_s17 = sphi %s1997_s17, %s2817_s17   ;;  %s1930_s16 = sphi %s1995_s16, %s2816_s16   ;;  %s1926_s15 = sphi %s1993_s15, %s2808_s15   ;;  %s1922_s14 = sphi %s1991_s14, %s2815_s14   ;;  %s1918_s13 = sphi %s1989_s13, %s2814_s13   ;;  %s1914_s12 = sphi %s1987_s12, %s2813_s12   ;;  %s1910_s11 = sphi %s1985_s11, %s2812_s11   ;;  %s1906_s10 = sphi %s1983_s10, %s2811_s10   ;;  %s1902_s9 = sphi %s1981_s9, %s2810_s9  }
   0xd   : > { %s1573_s21 = sadd.s32 4294967294, %s1942_s19   ;;  %p45_p0 = scmp.ne.s32.totalorder %s1922_s14, %s1918_s13 }
   0xe   : > { %p46_p1 = scmp.eq.s32.totalorder %s1942_s19, 0  ;;  %p51_p2 = scmp.ne.s32.totalorder %s1918_s13, %s1914_s12 }
   0xf   : > { %p2041_p3 = scmp.eq.s32.totalorder %s1572_s20, 0  ;;  %p97_p5 = scmp.ne.s32.totalorder %s1910_s11, %s1906_s10 }
  0x10   : > { %p2045_p4 = por %p46_p1, %p45_p0  ;;  %p98_p7 = scmp.eq.s32.totalorder %s1572_s20, 3 }
  0x11   : > { %s2789_s23 = scalar_select %p2041_p3, 1, 0 }
  0x12   : > { %p2053_p6 = por %p2041_p3, %p51_p2  ;;  %p103_p8 = scmp.ne.s32.totalorder %s1906_s10, %s1902_s9 }
  0x13   : > { %p104_p9 = scmp.eq.s32.totalorder %s1573_s21, 3  ;;  %p2059_p10 = por %p98_p7, %p97_p5 }
  0x14   : > { %s2791_s25 = scalar_select %p2053_p6, 1, 0 }
  0x15   : > { %s2792_s26 = scalar_select %p2059_p10, 1, 0 }
  0x16   : > { %p1574_p11 = scmp.ge.s32.totalorder %s1942_s19, 1  ;;  %p2064_p12 = por %p104_p9, %p103_p8 }
  0x17   : > { %p111_p13 = scmp.lt.s32.totalorder %s1942_s19, 5  ;;  %s1944_s29 = smov [#allocation7]  }
  0x18   : > { %s2793_s27 = scalar_select %p2064_p12, 1, 0 }
  0x19   : > { %p2069_p0 = pnand %p1574_p11, %p111_p13  ;;  %s124_s30 = sshll.u32 %s1944_s29, 4  ;;  %s125_s30 = int_to_ptr.vmem [resolvable:$true] %s124_s30 }
  0x1a   : > { %2794 = sst [smem:[#allocation14_spill]] %s2793_s27  ;;  %p1647_p2 = scmp.lt.s32.totalorder %s1942_s19, 4 }
  0x1b   : > { %s2795_s28 = scalar_select %p2069_p0, 1, 0 }
  0x1c   : > { %p1634_p1 = pneg %p2069_p0  ;;  %p2084_p7 = pnand %p1647_p2, %p2045_p4 }
  0x1d   : > { %s2798_s1 = sld [smem:[#allocation16_spill]] }
  0x1e   : > { %p2078_p5 = pnand %p1634_p1, %p2041_p3 }
  0x1f   : > { %s2797_s4 = scalar_select %p2084_p7, 1, 0 }
  0x20   : > { %p1760_p9 = pneg %p2078_p5 }
  0x23   : > { %s1758_s7 = scalar_lea.hbm %s2798_s1, 128 }
  0x24   : > { %p1759_p8 = scmp.ne.s32.totalorder %s2798_s1, %s1758_s7  ;;  %p1765_p1 = scmp.lt.u32.totalorder %s1758_s7, %s2798_s1 }
  0x26   : > { %p1761_p11 = pnand %p1760_p9, %p1759_p8 }
  0x28   : > { %p1762_p13 = pneg %p1761_p11 }
  0x2a   : > { %p1767_p4 = pnand %p1765_p1, %p1762_p13 }
  0x2c   : > { %1770 = shalt.err (!%p1767_p4)
}
  0x2d   : > { %s1771_s24 = scalar_lea.vmem %s125_s30, 128  ;;  %p1779_p3 = scmp.lt.s32.totalorder %s125_s30, %s125_s30 }
  0x2e   : > { %p1772_p2 = scmp.ne.s32.totalorder %s125_s30, %s1771_s24  ;;  %p1780_p6 = scmp.lt.s32.totalorder %s1771_s24, %s1771_s24 }
  0x30   : > { %p1774_p12 = pnand %p1772_p2, %p1760_p9  ;;  %p1781_p0 = por %p1780_p6, %p1779_p3 }
  0x32   : > { %p1775_p10 = pneg %p1774_p12 }
  0x34   : > { %p1782_p7 = pnand %p1781_p0, %p1775_p10 }
  0x36   : > { %1785 = shalt.err (!%p1782_p7)
}
  0x37   : > { %1637 = dma.hbm_to_vmem [thread:$0]  (!%p2078_p5), %s2798_s1, 128, %s125_s30, [#allocation8]  }
  0x38   : > { %s28_s6 = sadd.s32 1, %s1934_s17  ;;  %s31_s7 = sadd.s32 1, %s1938_s18 }
  0x39   : > { %p29_p12 = scmp.ge.s32.totalorder %s28_s6, 2  ;;  %s135_s8 = sand.u32 1, %s1922_s14  }
  0x3a   : > { %s87_s12 = sadd.s32 1, %s1910_s11  ;;  %s1577_s3 = sshll.u32 %s135_s8, 6 }
  0x3b   : > { %s2820_s6 = smov (%p29_p12, %s28_s6), 0  ;;  %s2822_s7 = smov (!%p29_p12, %s31_s7), %s1938_s18 }
  0x3c   : > { %2799 = sst [smem:[#allocation15_spill]] %s2820_s6  ;;  %p33_p3 = scmp.ge.s32.totalorder %s2822_s7, 2 }
  0x3d   : > { %s1600_s20 = sshll.u32 %s1938_s18, 10  ;;  %s83_s21 = ssub.s32 %s1934_s17, %s2820_s6 }
  0x3e   : > { %s139_s30 = scalar_lea.vmem [#allocation4], %s1577_s3  ;;  %s2824_s7 = smov (%p33_p3, %s2822_s7), 0 }
  0x3f   : > { %s146_s24 = sshll.u32 %s139_s30, 4  ;;  %s2119_s22 = scalar_lea.hbm %s2775_s0, %s1600_s20  ;;  %s2121_s24 = int_to_ptr.vmem [resolvable:$true] %s146_s24 }
  0x40   : > { %s35_s1 = ssub.s32 %s1938_s18, %s2824_s7  ;;  %s2800_s3 = sadd.s32 1, %s1922_s14 }
  0x41   : > { %p36_p6 = scmp.eq.s32.totalorder %s35_s1, 0  ;;  %s84_s6 = sor.u32 %s83_s21, %s35_s1 }
  0x42   : > { %p85_p10 = scmp.eq.s32.totalorder %s84_s6, 0  ;;  %s2133_s27 = scalar_lea.sflag [#allocation5], %s135_s8 }
  0x43   : > { %s2128_s30 = scalar_select %p36_p6, %s1922_s14, %s2800_s3  }
  0x44   : > { %s2131_s17 = scalar_select %p85_p10, %s1910_s11, %s87_s12  }
  0x45   : > { %s1786_s29 = scalar_lea.hbm %s2119_s22, 1024  ;;  %p2801_p5 = scmp.ne.s32.totalorder %s2797_s4, 0 }
  0x46   : > { %p1787_p0 = scmp.ne.s32.totalorder %s2119_s22, %s1786_s29  ;;  %s1791_s1 = scalar_lea.hbm %s2775_s0, 2048 }
  0x47   : > { %p1788_p7 = pneg %p2801_p5  ;;  %p1792_p11 = scmp.lt.u32.totalorder %s2119_s22, %s2775_s0 }
  0x48   : > { %p1793_p13 = scmp.lt.u32.totalorder %s1791_s1, %s1786_s29  ;;  %p1795_p4 = scmp.lt.u32.totalorder %s1786_s29, %s2119_s22 }
  0x49   : > { %p1789_p8 = pnand %p1788_p7, %p1787_p0 }
  0x4a   : > { %p1794_p1 = por %p1793_p13, %p1792_p11 }
  0x4b   : > { %p1790_p9 = pneg %p1789_p8 }
  0x4c   : > { %p1796_p2 = por %p1795_p4, %p1794_p1 }
  0x4e   : > { %p1797_p12 = pnand %p1796_p2, %p1790_p9 }
  0x50   : > { %1800 = shalt.err (!%p1797_p12)
}
  0x51   : > { %s1801_s8 = scalar_lea.vmem %s2121_s24, 1024  ;;  %s1945_s12 = smov [#allocation4]  }
  0x52   : > { %p1802_p3 = scmp.ne.s32.totalorder %s2121_s24, %s1801_s8  ;;  %s1806_s3 = sshll.u32 %s1945_s12, 4  ;;  %s1807_s3 = int_to_ptr.vmem [resolvable:$false] %s1806_s3 }
  0x53   : > { %s1808_s20 = scalar_lea.vmem %s1807_s3, 2048  ;;  %p1809_p0 = scmp.lt.s32.totalorder %s2121_s24, %s1807_s3 }
  0x54   : > { %p1804_p6 = pnand %p1802_p3, %p1788_p7  ;;  %p1810_p8 = scmp.lt.s32.totalorder %s1808_s20, %s1801_s8 }
  0x56   : > { %p1805_p10 = pneg %p1804_p6  ;;  %p1811_p11 = por %p1810_p8, %p1809_p0 }
  0x58   : > { %p1812_p13 = pnand %p1811_p11, %p1805_p10 }
  0x5a   : > { %1815 = shalt.err (!%p1812_p13)
}
  0x5b   : > { %s1946_s29 = smov 128   ;;  %s1947_s5 = smov 8  }
  0x5c   : > { %1641 = dma.hbm_to_vmem [thread:$0]  (!%p2801_p5), %s2119_s22, 1024, %s2121_s24, %s2133_s27, %s1946_s29, %s1946_s29, %s1947_s5  }
  0x5d   : > { %p2802_p7 = scmp.ne.s32.totalorder %s2795_s28, 0 }
  0x5e   : > { %s160_s1 = sand.u32 (!%p2802_p7), 1, %s1918_s13   ;;  %p2803_p9 = scmp.ne.s32.totalorder (!%p2802_p7), %s2791_s25, 0 }
  0x5f   : > { %158 = sbr.rel (%p2802_p7) target bundleno = 935 (0x3a7), region = 28  ;;  %s2164_s6 = sshll.u32 (!%p2802_p7), %s160_s1, 6 }
  0x60   : > { %s161_s21 = scalar_lea.sflag (!%p2802_p7), [#allocation5], %s160_s1  ;;  %s164_s8 = scalar_lea.vmem (!%p2802_p7), [#allocation4], %s2164_s6 }
  0x66   : > { %1889 = dma.done.wait (%p2803_p9), %s161_s21, 1024  }
  0x67   : > { %1891 = vsyncadd (%p2803_p9), %s161_s21, 4294966272  ;;  %p2804_p1 = scmp.ne.s32.totalorder %s2789_s23, 0 }
  0x69   : > { %1893 = dma.done.wait (%p2804_p1), [#allocation8], 128  }
  0x6a   : > { %1895 = vsyncadd (%p2804_p1), [#allocation8], 4294967168  ;;  %s2176_s22 = sshll.u32 %s1926_s15, 3  ;;  %vm190_vm0 = vcmask 139264   ;;  %vm199_vm1 = vcmask 7168   ;;  %vm201_vm2 = vcmask 1024  }
  0x6b   : > { %s1585_s27 = sadd.s32 4294967295, %s2176_s22  ;;  %vm209_vm3 = vcmask 146568   ;;  %vm211_vm4 = vcmask 140424   ;;  %v1948_v0 = vmov 0.0   ;;  %s246_s23 = sadd.s32 8, %s2176_s22  ;;  %vm240_vm5 = vcmask 138248  }
  0x6c   : > { %193 = vst.msk [vmem:[#allocation2 + $0x20] sm:$0x1] %vm190_vm0, %v1948_v0  ;;  %197 = vst.msk [vmem:[#allocation2 + $0x29] sm:$0x1] %vm190_vm0, %v1948_v0  ;;  %s186_s25 = sand.u32 1, %s1906_s10   ;;  %s2228_s4 = scalar_lea.vmem %s164_s8, %s2176_s22 [#allocation4] }
  0x6d   : > { %191 = vst.msk [vmem:[#allocation2] sm:$0x1] %vm190_vm0, %v1948_v0  ;;  %192 = vst.msk [vmem:[#allocation2 + $0x10] sm:$0x1] %vm190_vm0, %v1948_v0  ;;  %s2223_s28 = sshll.u32 %s186_s25, 3  ;;  %v222_v1 = vld [vmem:[%s2228_s4 + $0x20] sm:$0xff] }
  0x6e   : > { %194 = vst.msk [vmem:[#allocation2 + $0x30] sm:$0x1] %vm190_vm0, %v1948_v0  ;;  %195 = vst.msk [vmem:[#allocation2 + $0x9] sm:$0x1] %vm190_vm0, %v1948_v0  ;;  %v220_v2 = vld [vmem:[%s2228_s4] sm:$0xff]  ;;  %s1949_s24 = smov 1  }
  0x6f   : > { %196 = vst.msk [vmem:[#allocation2 + $0x19] sm:$0x1] %vm190_vm0, %v1948_v0  ;;  %198 = vst.msk [vmem:[#allocation2 + $0x39] sm:$0x1] %vm190_vm0, %v1948_v0  ;;  %232 = vrot.lane.b32.xlu1 %v222_v1, %s1949_s24  ;;  %228 = vrot.lane.b32.xlu0 %v220_v2, %s1949_s24  ;;  %v223_v3 = vld [vmem:[%s2228_s4 + $0x30] sm:$0xff]  ;;  %s188_s12 = scalar_lea.vmem [#allocation9], %s2223_s28 }
  0x70   : > { %205 = vst.msk [vmem:[#allocation2 + $0x20] sm:$0xff] %vm199_vm1, %v1948_v0  ;;  %200 = vst.msk [vmem:[#allocation2] sm:$0xff] %vm199_vm1, %v1948_v0  ;;  %v221_v4 = vld [vmem:[%s2228_s4 + $0x10] sm:$0xff]  ;;  %p1586_p5 = scmp.lt.s32.totalorder %s1585_s27, 0 }
  0x71   : > { %206 = vst.msk [vmem:[#allocation2 + $0x28] sm:$0x3] %vm201_vm2, %v1948_v0  ;;  %202 = vst.msk [vmem:[#allocation2 + $0x8] sm:$0x3] %vm201_vm2, %v1948_v0  ;;  %s251_s3 = scalar_lea.vmem (!%p1586_p5), %s164_s8, %s1585_s27 [#allocation4]  ;;  %s1950_s20 = smov (!%p1586_p5), 1   ;;  %vm272_vm6 = vcmask (!%p1586_p5), 131080  }
  0x72   : > { %203 = vst.msk [vmem:[#allocation2 + $0x10] sm:$0xff] %vm199_vm1, %v1948_v0  ;;  %207 = vst.msk [vmem:[#allocation2 + $0x30] sm:$0xff] %vm199_vm1, %v1948_v0  ;;  %v254_v9 = vld [vmem:[%s251_s3 + $0x20] sm:$0x1] (!%p1586_p5)  ;;  %v255_v11 = vld [vmem:[%s251_s3 + $0x30] sm:$0x1] (!%p1586_p5) }
  0x73   : > { %204 = vst.msk [vmem:[#allocation2 + $0x18] sm:$0x3] %vm201_vm2, %v1948_v0  ;;  %208 = vst.msk [vmem:[#allocation2 + $0x38] sm:$0x3] %vm201_vm2, %v1948_v0  ;;  %234 = vrot.lane.b32.xlu1 %v223_v3, %s1949_s24  ;;  %230 = vrot.lane.b32.xlu0 %v221_v4, %s1949_s24  ;;  %v252_v10 = vld [vmem:[%s251_s3] sm:$0x1] (!%p1586_p5) }
  0x74   : > { %215 = vst.msk [vmem:[#allocation2 + $0x20] sm:$0xff] %vm209_vm3, %v1948_v0  ;;  %210 = vst.msk [vmem:[#allocation2] sm:$0xff] %vm209_vm3, %v1948_v0  ;;  %v253_v12 = vld [vmem:[%s251_s3 + $0x10] sm:$0x1] (!%p1586_p5) }
  0x75   : > { %216 = vst.msk [vmem:[#allocation2 + $0x28] sm:$0x3] %vm211_vm4, %v1948_v0  ;;  %212 = vst.msk [vmem:[#allocation2 + $0x8] sm:$0x3] %vm211_vm4, %v1948_v0 }
  0x76   : > { %217 = vst.msk [vmem:[#allocation2 + $0x30] sm:$0xff] %vm209_vm3, %v1948_v0  ;;  %213 = vst.msk [vmem:[#allocation2 + $0x10] sm:$0xff] %vm209_vm3, %v1948_v0 }
  0x77   : > { %218 = vst.msk [vmem:[#allocation2 + $0x38] sm:$0x3] %vm211_vm4, %v1948_v0  ;;  %214 = vst.msk [vmem:[#allocation2 + $0x18] sm:$0x3] %vm211_vm4, %v1948_v0  ;;  %264 = vrot.lane.b32.xlu1 (!%p1586_p5), %v254_v9, %s1950_s20  ;;  %260 = vrot.lane.b32.xlu0 (!%p1586_p5), %v252_v10, %s1950_s20 }
  0x7b   : > { %266 = vrot.lane.b32.xlu1 (!%p1586_p5), %v255_v11, %s1950_s20  ;;  %262 = vrot.lane.b32.xlu0 (!%p1586_p5), %v253_v12, %s1950_s20 }
  0xe0   : > { %250 = sbr.rel (%p1586_p5) target bundleno = 239 (0xef), region = 40 }
  0xe1   : > { %v233_v5 = vpop.permute.xlu1 %232  ;;  %v229_v6 = vpop.permute.xlu0 %228 }
  0xe2   : > { %243 = vst.msk [vmem:[#allocation2 + $0x21] sm:$0xff] %vm240_vm5, %v233_v5  ;;  %241 = vst.msk [vmem:[#allocation2 + $0x1] sm:$0xff] %vm240_vm5, %v229_v6 }
  0xe5   : > { %v235_v7 = vpop.permute.xlu1 %234  ;;  %v231_v8 = vpop.permute.xlu0 %230 }
  0xe6   : > { %244 = vst.msk [vmem:[#allocation2 + $0x31] sm:$0xff] %vm240_vm5, %v235_v7  ;;  %242 = vst.msk [vmem:[#allocation2 + $0x11] sm:$0xff] %vm240_vm5, %v231_v8 }
  0xe9   : > { %v265_v13 = vpop.permute.xlu1 %264  ;;  %v261_v14 = vpop.permute.xlu0 %260 }
  0xea   : > { %275 = vst.msk [vmem:[#allocation2 + $0x20] sm:$0x1] %vm272_vm6, %v265_v13  ;;  %273 = vst.msk [vmem:[#allocation2] sm:$0x1] %vm272_vm6, %v261_v14 }
  0xed   : > { %v267_v15 = vpop.permute.xlu1 %266  ;;  %v263_v16 = vpop.permute.xlu0 %262 }
  0xee   : > { %276 = vst.msk [vmem:[#allocation2 + $0x30] sm:$0x1] %vm272_vm6, %v267_v15  ;;  %274 = vst.msk [vmem:[#allocation2 + $0x10] sm:$0x1] %vm272_vm6, %v263_v16 }
  0xef PF: > { %p1587_p4 = scmp.ge.s32.totalorder %s246_s23, 16 }
  0xf0   : > { %v1591_v17 = vld [vmem:[%s2228_s4 + $0x28] sm:$0x1] (!%p1587_p4)  ;;  %s1951_s29 = smov (!%p1587_p4), 1   ;;  %v1592_v19 = vld [vmem:[%s2228_s4 + $0x38] sm:$0x1] (!%p1587_p4)  ;;  %vm302_vm7 = vcmask (!%p1587_p4), 131080  }
  0xf1   : > { %280 = sbr.rel (%p1587_p4) target bundleno = 362 (0x16a), region = 44  ;;  %v1589_v18 = vld [vmem:[%s2228_s4 + $0x8] sm:$0x1] (!%p1587_p4)  ;;  %294 = vrot.lane.b32.xlu1 (!%p1587_p4), %v1591_v17, %s1951_s29  ;;  %v1590_v20 = vld [vmem:[%s2228_s4 + $0x18] sm:$0x1] (!%p1587_p4) }
  0xf2   : > { %290 = vrot.lane.b32.xlu0 (!%p1587_p4), %v1589_v18, %s1951_s29 }
  0xf5   : > { %296 = vrot.lane.b32.xlu1 (!%p1587_p4), %v1592_v19, %s1951_s29 }
  0xf6   : > { %292 = vrot.lane.b32.xlu0 (!%p1587_p4), %v1590_v20, %s1951_s29 }
 0x163   : > { %v295_v21 = vpop.permute.xlu1 %294 }
 0x164   : > { %v291_v22 = vpop.permute.xlu0 %290  ;;  %305 = vst.msk [vmem:[#allocation2 + $0x29] sm:$0x1] %vm302_vm7, %v295_v21 }
 0x165   : > { %303 = vst.msk [vmem:[#allocation2 + $0x9] sm:$0x1] %vm302_vm7, %v291_v22 }
 0x167   : > { %v297_v23 = vpop.permute.xlu1 %296 }
 0x168   : > { %v293_v24 = vpop.permute.xlu0 %292  ;;  %306 = vst.msk [vmem:[#allocation2 + $0x39] sm:$0x1] %vm302_vm7, %v297_v23 }
 0x169   : > { %304 = vst.msk [vmem:[#allocation2 + $0x19] sm:$0x1] %vm302_vm7, %v293_v24 }
 0x16a PF: > { %v2247_v25 = vld [vmem:[#allocation2 + $0x20] sm:$0xff]  ;;  %s1952_s5 = smov 127   ;;  %v2255_v27 = vld [vmem:[#allocation2 + $0x30] sm:$0xff]  ;;  %vm1019_vm8 = vcmask 1045504   ;;  %s1953_s1 = smov 126   ;;  %vm666_vm9 = vcmask 1046528   ;;  %v320_v61 = vlaneseq }
 0x16b   : > { %v2249_v26 = vld [vmem:[#allocation2] sm:$0xff]  ;;  %434 = vrot.lane.b32.xlu1 %v2247_v25, %s1952_s5  ;;  %v2257_v28 = vld [vmem:[#allocation2 + $0x10] sm:$0xff]  ;;  %v1029_v35 = vrot.slane %v2255_v27, 2  ;;  %v312_v37 = vld [vmem:[#allocation2 + $0x28] sm:$0x3]  ;;  %v1026_v39 = vrot.slane %v2247_v25, 2 }
 0x16c   : > { %430 = vrot.lane.b32.xlu0 %v2249_v26, %s1952_s5  ;;  %v308_v30 = vld [vmem:[#allocation2 + $0x8] sm:$0x3]  ;;  %v1023_v31 = vrot.slane %v2257_v28, 2  ;;  %v1020_v33 = vrot.slane %v2249_v26, 2  ;;  %v1027_v40 = vrot.slane %v312_v37, 2  ;;  %v670_v41 = vrot.slane %v2257_v28, 1 }
 0x16d   : > { %v1021_v34 = vrot.slane %v308_v30, 2  ;;  %v667_v43 = vrot.slane %v2249_v26, 1  ;;  %v668_v44 = vrot.slane %v308_v30, 1  ;;  %v676_v51 = vrot.slane %v2255_v27, 1  ;;  %s1956_s6 = smov 16   ;;  %s1957_s21 = smov 32  }
 0x16e   : > { %v2279_v48 = vsel %vm1019_vm8, %v1026_v39, %v1027_v40  ;;  %v673_v55 = vrot.slane %v2247_v25, 1  ;;  %v674_v56 = vrot.slane %v312_v37, 1  ;;  %v1954_v59 = vmov 1983009808   ;;  %s1958_s8 = smov 48   ;;  %s1959_s22 = smov 64  }
 0x16f   : > { %436 = vrot.lane.b32.xlu1 %v2255_v27, %s1952_s5  ;;  %v314_v36 = vld [vmem:[#allocation2 + $0x38] sm:$0x3]  ;;  %v2275_v46 = vsel %vm1019_vm8, %v1020_v33, %v1021_v34  ;;  %v669_v54 = vsel %vm666_vm9, %v667_v43, %v668_v44  ;;  %v318_v60 = vunpack.c.l.s4 %v1954_v59  ;;  %v321_v63 = vshrl.u32 %v320_v61, 7  ;;  %s1960_s27 = smov 80   ;;  %s1961_s23 = smov 96  }
 0x170   : > { %432 = vrot.lane.b32.xlu0 %v2257_v28, %s1952_s5  ;;  %v310_v29 = vld [vmem:[#allocation2 + $0x18] sm:$0x3]  ;;  %v1030_v38 = vrot.slane %v314_v36, 2  ;;  %v1037_v50 = vcombine.high %v2275_v46, %v2279_v48  ;;  %v677_v52 = vrot.slane %v314_v36, 1  ;;  %v675_v58 = vsel %vm666_vm9, %v673_v55, %v674_v56  ;;  %s1962_s4 = smov 112   ;;  %s1596_s24 = sshll.u32 %s1930_s16, 1 }
 0x171   : > { %v1024_v32 = vrot.slane %v310_v29, 2  ;;  %v671_v42 = vrot.slane %v310_v29, 1  ;;  %v319_v62 = vunpack.c.0.s8 %v318_v60  ;;  %v315_v2 = vcombine.low %v2249_v26, %v2247_v25  ;;  %s1469_s3 = sadd.s32 %s1926_s15, %s1596_s24  ;;  %s1473_s29 = sshll.u32 %s188_s12, 4  ;;  %s2711_s29 = int_to_ptr.vmem [resolvable:$true] %s1473_s29 }
 0x172   : > { %v2277_v47 = vsel %vm1019_vm8, %v1029_v35, %v1030_v38  ;;  %v678_v57 = vsel %vm666_vm9, %v676_v51, %v677_v52  ;;  %v683_v4 = vcombine.low %v669_v54, %v675_v58  ;;  %v331_v5 = vcombine.low %v2257_v28, %v2255_v27  ;;  %s1597_s20 = sshll.u32 %s1469_s3, 7  ;;  %s1458_s16 = scalar_lea.sflag [#allocation6], %s186_s25 }
 0x173   : > { %548 = vrot.lane.b32.xlu1 %v2257_v28, %s1953_s1  ;;  %v2273_v45 = vsel %vm1019_vm8, %v1023_v31, %v1024_v32  ;;  %v672_v53 = vsel %vm666_vm9, %v670_v41, %v671_v42  ;;  %v2303_v3 = vsub.s32 %v319_v62, %v321_v63  ;;  %v1955_v6 = vmov 1934713408   ;;  %s1816_s15 = scalar_lea.vmem %s2711_s29, 128  ;;  %p2805_p12 = scmp.ne.s32.totalorder %s2792_s26, 0 }
 0x174   : > { %546 = vrot.lane.b32.xlu0 %v2249_v26, %s1953_s1  ;;  %v1053_v49 = vcombine.high %v2273_v45, %v2277_v47  ;;  %v699_v1 = vcombine.low %v672_v53, %v678_v57  ;;  %v350_v7 = vunpack.c.l.s4 %v1955_v6  ;;  %v316_v18 = vcombine.high %v2249_v26, %v2247_v25  ;;  %p1817_p2 = scmp.ne.s32.totalorder %s2711_s29, %s1816_s15 }
 0x175   : > { %v691_v9 = vrot.slane %v683_v4, %v2303_v3  ;;  %v323_v10 = vrot.slane %v315_v2, %v2303_v3  ;;  %v339_v11 = vrot.slane %v331_v5, %v2303_v3  ;;  %v700_v19 = vcombine.high %v672_v53, %v678_v57 }
 0x176   : > { %v707_v8 = vrot.slane %v699_v1, %v2303_v3  ;;  %v351_v12 = vunpack.c.0.s8 %v350_v7  ;;  %v684_v20 = vcombine.high %v669_v54, %v675_v58  ;;  %v332_v22 = vcombine.high %v2257_v28, %v2255_v27  ;;  %p1818_p3 = pnand %p1817_p2, %p2805_p12 }
 0x177   : > { %552 = vrot.lane.b32.xlu1 %v2255_v27, %s1953_s1  ;;  %v347_v13 = vcombine.low %v323_v10, %v339_v11  ;;  %v348_v21 = vcombine.high %v323_v10, %v339_v11  ;;  %v330_v26 = vrot.slane %v316_v18, %v2303_v3  ;;  %v2349_v27 = vrot.slane %v1037_v50, %v2303_v3 }
 0x178   : > { %550 = vrot.lane.b32.xlu0 %v2247_v25, %s1953_s1  ;;  %v2321_v14 = vsub.s32 %v351_v12, %v321_v63  ;;  %v715_v15 = vcombine.low %v691_v9, %v707_v8  ;;  %v716_v29 = vcombine.high %v691_v9, %v707_v8  ;;  %v1052_v25 = vcombine.low %v2273_v45, %v2277_v47  ;;  %p1819_p6 = pneg %p1818_p3 }
 0x179   : > { %v2352_v28 = vrot.slane %v1053_v49, %v2303_v3  ;;  %v1036_v30 = vcombine.low %v2275_v46, %v2279_v48  ;;  %v346_v31 = vrot.slane %v332_v22, %v2303_v3  ;;  %v698_v32 = vrot.slane %v684_v20, %v2303_v3 }
 0x17a   : > { %v2326_v16 = vrot.slane %v347_v13, %v2321_v14  ;;  %v2331_v17 = vrot.slane %v715_v15, %v2321_v14  ;;  %v714_v33 = vrot.slane %v700_v19, %v2303_v3  ;;  %v362_v34 = vrot.slane %v348_v21, %v2321_v14 }
 0x17b   : > { %789 = vrot.lane.b32.xlu1 %v672_v53, %s1952_s5  ;;  %v730_v35 = vrot.slane %v716_v29, %v2321_v14  ;;  %v1084_v36 = vcombine.low %v2349_v27, %v2352_v28  ;;  %v1060_v37 = vrot.slane %v1052_v25, %v2303_v3  ;;  %v1044_v38 = vrot.slane %v1036_v30, %v2303_v3 }
 0x17c   : > { %787 = vrot.lane.b32.xlu0 %v669_v54, %s1952_s5  ;;  %v379_v23 = vcombine.high %v2326_v16, %v1948_v0  ;;  %v747_v24 = vcombine.high %v2331_v17, %v1948_v0  ;;  %v731_v39 = vcombine.low %v698_v32, %v714_v33  ;;  %v380_v40 = vcombine.high %v362_v34, %v1948_v0 }
 0x17d   : > { %v363_v41 = vcombine.low %v330_v26, %v346_v31  ;;  %v748_v42 = vcombine.high %v730_v35, %v1948_v0  ;;  %v1068_v44 = vcombine.low %v1044_v38, %v1060_v37  ;;  %v364_v50 = vcombine.high %v330_v26, %v346_v31 }
 0x17e   : > { %v1069_v55 = vcombine.high %v1044_v38, %v1060_v37  ;;  %vm411_vm10 = vcmask 130048   ;;  %vm413_vm11 = vcmask 261120   ;;  %vm415_vm12 = vcmask 392192  }
 0x17f   : > { %793 = vrot.lane.b32.xlu1 %v678_v57, %s1952_s5  ;;  %v371_v43 = vrot.slane %v363_v41, %v2321_v14  ;;  %vm417_vm13 = vcmask 523264   ;;  %vm419_vm14 = vcmask 654336   ;;  %vm421_vm15 = vcmask 785408  }
 0x180   : > { %791 = vrot.lane.b32.xlu0 %v675_v58, %s1952_s5  ;;  %vm423_vm0 = vcmask 916480   ;;  %vm1964_vm1 = vmmov 0   ;;  %vm1382_vm2 = vcmask 1043456   ;;  %vm1378_vm3 = vcmask 293888  }
 0x181   : > { %1617 = vmatprep.mubr.msk.f32.mxu0 %vm1964_vm1, %v1948_v0 }
 0x183   : > { %905 = vrot.lane.b32.xlu1 %v672_v53, %s1953_s1  ;;  %v1085_v53 = vcombine.high %v2349_v27, %v2352_v28 }
 0x184   : > { %903 = vrot.lane.b32.xlu0 %v669_v54, %s1953_s1  ;;  %v378_v54 = vrot.slane %v364_v50, %v2321_v14 }
 0x187   : > { %909 = vrot.lane.b32.xlu1 %v678_v57, %s1953_s1  ;;  %v1083_v57 = vrot.slane %v1069_v55, %v2321_v14 }
 0x188   : > { %907 = vrot.lane.b32.xlu0 %v675_v58, %s1953_s1  ;;  %v382_v58 = vcombine.high %v378_v54, %v1948_v0 }
 0x189   : > { %v1101_v59 = vcombine.high %v1083_v57, %v1948_v0 }
 0x18b   : > { %1142 = vrot.lane.b32.xlu1 %v2273_v45, %s1952_s5 }
 0x18c   : > { %1140 = vrot.lane.b32.xlu0 %v2275_v46, %s1952_s5 }
 0x18f   : > { %1146 = vrot.lane.b32.xlu1 %v2277_v47, %s1952_s5 }
 0x190   : > { %1144 = vrot.lane.b32.xlu0 %v2279_v48, %s1952_s5 }
 0x193   : > { %1258 = vrot.lane.b32.xlu1 %v2273_v45, %s1953_s1  ;;  %v739_v45 = vrot.slane %v731_v39, %v2321_v14 }
 0x194   : > { %1256 = vrot.lane.b32.xlu0 %v2275_v46, %s1953_s1  ;;  %v732_v46 = vcombine.high %v698_v32, %v714_v33 }
 0x195   : > { %v749_v49 = vcombine.high %v739_v45, %v1948_v0 }
 0x196   : > { %v746_v52 = vrot.slane %v732_v46, %v2321_v14 }
 0x197   : > { %1262 = vrot.lane.b32.xlu1 %v2277_v47, %s1953_s1  ;;  %v381_v47 = vcombine.high %v371_v43, %v1948_v0 }
 0x198   : > { %1260 = vrot.lane.b32.xlu0 %v2279_v48, %s1953_s1  ;;  %v2378_v48 = vrot.slane %v1068_v44, %v2321_v14  ;;  %v750_v56 = vcombine.high %v746_v52, %v1948_v0 }
 0x19a   : > { %v1100_v51 = vcombine.high %v2378_v48, %v1948_v0 }
 0x19b   : > { %752 = vrot.lane.b32.xlu1 %v747_v24, %s1956_s6 }
 0x19c   : > { %384 = vrot.lane.b32.xlu0 %v379_v23, %s1956_s6 }
 0x19f   : > { %756 = vrot.lane.b32.xlu1 %v730_v35, %s1957_s21 }
 0x1a0   : > { %388 = vrot.lane.b32.xlu0 %v362_v34, %s1957_s21 }
 0x1a3   : > { %760 = vrot.lane.b32.xlu1 %v748_v42, %s1958_s8 }
 0x1a4   : > { %392 = vrot.lane.b32.xlu0 %v380_v40, %s1958_s8 }
 0x1a7   : > { %764 = vrot.lane.b32.xlu1 %v739_v45, %s1959_s22 }
 0x1a8   : > { %396 = vrot.lane.b32.xlu0 %v371_v43, %s1959_s22 }
 0x1ab   : > { %768 = vrot.lane.b32.xlu1 %v749_v49, %s1960_s27 }
 0x1ac   : > { %400 = vrot.lane.b32.xlu0 %v381_v47, %s1960_s27 }
 0x1af   : > { %772 = vrot.lane.b32.xlu1 %v746_v52, %s1961_s23 }
 0x1b0   : > { %1105 = vrot.lane.b32.xlu0 %v1100_v51, %s1956_s6 }
 0x1b3   : > { %776 = vrot.lane.b32.xlu1 %v750_v56, %s1962_s4 }
 0x1b4   : > { %404 = vrot.lane.b32.xlu0 %v378_v54, %s1961_s23 }
 0x1b8   : > { %1109 = vrot.lane.b32.xlu0 %v1083_v57, %s1957_s21 }
 0x1bc   : > { %408 = vrot.lane.b32.xlu0 %v382_v58, %s1962_s4 }
 0x1c0   : > { %1113 = vrot.lane.b32.xlu0 %v1101_v59, %s1958_s8 }
 0x1dd   : > { %v435_v60 = vpop.permute.xlu1 %434 }
 0x1de   : > { %v431_v61 = vpop.permute.xlu0 %430 }
 0x1df   : > { %v442_v62 = vcombine.low %v431_v61, %v435_v60  ;;  %v443_v2 = vcombine.high %v431_v61, %v435_v60 }
 0x1e1   : > { %v437_v63 = vpop.permute.xlu1 %436  ;;  %v450_v6 = vrot.slane %v442_v62, %v2303_v3  ;;  %v457_v11 = vrot.slane %v443_v2, %v2303_v3 }
 0x1e2   : > { %v433_v1 = vpop.permute.xlu0 %432 }
 0x1e3   : > { %v458_v4 = vcombine.low %v433_v1, %v437_v63  ;;  %v459_v5 = vcombine.high %v433_v1, %v437_v63 }
 0x1e5   : > { %v466_v7 = vrot.slane %v458_v4, %v2303_v3  ;;  %v473_v8 = vrot.slane %v459_v5, %v2303_v3  ;;  %v549_v9 = vpop.permute.xlu1 %548 }
 0x1e6   : > { %v547_v10 = vpop.permute.xlu0 %546 }
 0x1e7   : > { %v475_v12 = vcombine.high %v450_v6, %v466_v7  ;;  %v490_v13 = vcombine.low %v457_v11, %v473_v8  ;;  %v474_v24 = vcombine.low %v450_v6, %v466_v7  ;;  %v491_v29 = vcombine.high %v457_v11, %v473_v8 }
 0x1e9   : > { %v489_v15 = vrot.slane %v475_v12, %v2321_v14  ;;  %v553_v18 = vpop.permute.xlu1 %552  ;;  %v498_v30 = vrot.slane %v490_v13, %v2321_v14  ;;  %v505_v37 = vrot.slane %v491_v29, %v2321_v14  ;;  %v2420_v39 = vrot.slane %v474_v24, %v2321_v14 }
 0x1ea   : > { %v551_v19 = vpop.permute.xlu0 %550  ;;  %v574_v20 = vcombine.low %v549_v9, %v553_v18  ;;  %v575_v21 = vcombine.high %v549_v9, %v553_v18 }
 0x1eb   : > { %v558_v22 = vcombine.low %v547_v10, %v551_v19  ;;  %v559_v23 = vcombine.high %v547_v10, %v551_v19  ;;  %515 = vrot.lane.b32.xlu1 %v489_v15, %s1957_s21  ;;  %v506_v43 = vcombine.high %v2420_v39, %v1948_v0  ;;  %v507_v50 = vcombine.high %v489_v15, %v1948_v0 }
 0x1ec   : > { %v582_v25 = vrot.slane %v574_v20, %v2303_v3  ;;  %v589_v31 = vrot.slane %v575_v21, %v2303_v3  ;;  %v508_v60 = vcombine.high %v498_v30, %v1948_v0  ;;  %v509_v5 = vcombine.high %v505_v37, %v1948_v0 }
 0x1ed   : > { %v566_v26 = vrot.slane %v558_v22, %v2303_v3  ;;  %v573_v32 = vrot.slane %v559_v23, %v2303_v3  ;;  %v2412_v33 = vpop.permute.xlu1 %789 }
 0x1ee   : > { %v2414_v34 = vpop.permute.xlu0 %787 }
 0x1ef   : > { %v591_v35 = vcombine.high %v566_v26, %v582_v25  ;;  %523 = vrot.lane.b32.xlu1 %v498_v30, %s1959_s22  ;;  %v606_v40 = vcombine.low %v573_v32, %v589_v31  ;;  %v590_v44 = vcombine.low %v566_v26, %v582_v25  ;;  %v607_v45 = vcombine.high %v573_v32, %v589_v31 }
 0x1f0   : > { %v1963_v31 = vmov 0.0|0.0  }
 0x1f1   : > { %v605_v38 = vrot.slane %v591_v35, %v2321_v14  ;;  %v2422_v41 = vpop.permute.xlu1 %793  ;;  %v614_v49 = vrot.slane %v606_v40, %v2321_v14  ;;  %v621_v54 = vrot.slane %v607_v45, %v2321_v14  ;;  %v2436_v55 = vrot.slane %v590_v44, %v2321_v14  ;;  %1620 = vmatprep.subr.bf16.mxu0 %v1963_v31 }
 0x1f2   : > { %v2424_v42 = vpop.permute.xlu0 %791  ;;  %v815_v6 = vcombine.low %v2412_v33, %v2422_v41  ;;  %v816_v13 = vcombine.high %v2412_v33, %v2422_v41 }
 0x1f3   : > { %531 = vrot.lane.b32.xlu1 %v505_v37, %s1961_s23  ;;  %631 = vrot.lane.b32.xlu0 %v605_v38, %s1957_s21  ;;  %v622_v63 = vcombine.high %v2436_v55, %v1948_v0  ;;  %v799_v7 = vcombine.low %v2414_v34, %v2424_v42  ;;  %v623_v10 = vcombine.high %v605_v38, %v1948_v0 }
 0x1f4   : > { %v800_v15 = vcombine.high %v2414_v34, %v2424_v42  ;;  %v823_v23 = vrot.slane %v815_v6, %v2303_v3  ;;  %v624_v29 = vcombine.high %v614_v49, %v1948_v0  ;;  %v2494_v35 = vrot.slane %v816_v13, %v2303_v3 }
 0x1f5   : > { %v906_v46 = vpop.permute.xlu1 %905  ;;  %v807_v24 = vrot.slane %v799_v7, %v2303_v3  ;;  %v625_v40 = vcombine.high %v621_v54, %v1948_v0 }
 0x1f6   : > { %v904_v47 = vpop.permute.xlu0 %903  ;;  %v2497_v37 = vrot.slane %v800_v15, %v2303_v3 }
 0x1f7   : > { %511 = vrot.lane.b32.xlu1 %v506_v43, %s1956_s6  ;;  %639 = vrot.lane.b32.xlu0 %v614_v49, %s1959_s22  ;;  %v832_v38 = vcombine.high %v807_v24, %v823_v23 }
 0x1f9   : > { %v910_v51 = vpop.permute.xlu1 %909  ;;  %v846_v49 = vrot.slane %v832_v38, %v2321_v14 }
 0x1fa   : > { %v908_v52 = vpop.permute.xlu0 %907  ;;  %v931_v56 = vcombine.low %v906_v46, %v910_v51  ;;  %v932_v1 = vcombine.high %v906_v46, %v910_v51  ;;  %v831_v46 = vcombine.low %v807_v24, %v823_v23 }
 0x1fb   : > { %v915_v57 = vcombine.low %v904_v47, %v908_v52  ;;  %519 = vrot.lane.b32.xlu1 %v507_v50, %s1958_s8  ;;  %647 = vrot.lane.b32.xlu0 %v621_v54, %s1961_s23  ;;  %v916_v2 = vcombine.high %v904_v47, %v908_v52  ;;  %v847_v47 = vcombine.low %v2497_v37, %v2494_v35 }
 0x1fc   : > { %v939_v58 = vrot.slane %v931_v56, %v2303_v3  ;;  %v2471_v18 = vrot.slane %v932_v1, %v2303_v3 }
 0x1fd   : > { %v923_v59 = vrot.slane %v915_v57, %v2303_v3  ;;  %v2443_v61 = vpop.permute.xlu1 %1142  ;;  %v2475_v19 = vrot.slane %v916_v2, %v2303_v3  ;;  %v855_v56 = vrot.slane %v847_v47, %v2321_v14  ;;  %v2525_v57 = vrot.slane %v831_v46, %v2321_v14 }
 0x1fe   : > { %v2445_v62 = vpop.permute.xlu0 %1140 }
 0x1ff   : > { %527 = vrot.lane.b32.xlu1 %v508_v60, %s1960_s27  ;;  %627 = vrot.lane.b32.xlu0 %v622_v63, %s1956_s6  ;;  %v948_v4 = vcombine.high %v923_v59, %v939_v58  ;;  %v947_v32 = vcombine.low %v923_v59, %v939_v58  ;;  %v963_v33 = vcombine.low %v2475_v19, %v2471_v18 }
 0x201   : > { %v2456_v8 = vpop.permute.xlu1 %1146  ;;  %v962_v22 = vrot.slane %v948_v4, %v2321_v14  ;;  %v2507_v44 = vrot.slane %v963_v33, %v2321_v14  ;;  %v2510_v45 = vrot.slane %v947_v32, %v2321_v14  ;;  %v863_v4 = vcombine.high %v2525_v57, %v1948_v0 }
 0x202   : > { %v2458_v9 = vpop.permute.xlu0 %1144  ;;  %v1168_v11 = vcombine.low %v2443_v61, %v2456_v8  ;;  %v1169_v60 = vcombine.high %v2443_v61, %v2456_v8  ;;  %v864_v8 = vcombine.high %v846_v49, %v1948_v0 }
 0x203   : > { %v1152_v12 = vcombine.low %v2445_v62, %v2458_v9  ;;  %535 = vrot.lane.b32.xlu1 %v509_v5, %s1962_s4  ;;  %635 = vrot.lane.b32.xlu0 %v623_v10, %s1958_s8  ;;  %v979_v52 = vcombine.high %v2510_v45, %v1948_v0  ;;  %v1153_v63 = vcombine.high %v2445_v62, %v2458_v9 }
 0x204   : > { %v1176_v20 = vrot.slane %v1168_v11, %v2303_v3  ;;  %v2543_v62 = vrot.slane %v1169_v60, %v2303_v3 }
 0x205   : > { %v1160_v21 = vrot.slane %v1152_v12, %v2303_v3  ;;  %v2485_v26 = vpop.permute.xlu1 %1258  ;;  %v2546_v7 = vrot.slane %v1153_v63, %v2303_v3  ;;  %v1092_v12 = vrot.slane %v1084_v36, %v2321_v14 }
 0x206   : > { %v2483_v25 = vpop.permute.xlu0 %1256 }
 0x207   : > { %v1185_v30 = vcombine.high %v1160_v21, %v1176_v20  ;;  %988 = vrot.lane.b32.xlu1 %v962_v22, %s1957_s21  ;;  %643 = vrot.lane.b32.xlu0 %v624_v29, %s1960_s27  ;;  %v1184_v43 = vcombine.low %v1160_v21, %v1176_v20  ;;  %v1200_v13 = vcombine.low %v2546_v7, %v2543_v62 }
 0x208   : > { %v1201_v60 = vcombine.high %v2546_v7, %v2543_v62 }
 0x209   : > { %v1199_v34 = vrot.slane %v1185_v30, %v2321_v14  ;;  %v2502_v42 = vpop.permute.xlu1 %1262  ;;  %v2521_v54 = vrot.slane %v1184_v43, %v2321_v14  ;;  %v1208_v36 = vrot.slane %v1200_v13, %v2321_v14  ;;  %v865_v30 = vcombine.high %v855_v56, %v1948_v0 }
 0x20a   : > { %v2500_v41 = vpop.permute.xlu0 %1260  ;;  %v848_v43 = vcombine.high %v2497_v37, %v2494_v35  ;;  %v1215_v27 = vrot.slane %v1201_v60, %v2321_v14 }
 0x20b   : > { %1225 = vrot.lane.b32.xlu1 %v1199_v34, %s1957_s21  ;;  %651 = vrot.lane.b32.xlu0 %v625_v40, %s1962_s4  ;;  %v1216_v1 = vcombine.high %v2521_v54, %v1948_v0  ;;  %v1217_v15 = vcombine.high %v1199_v34, %v1948_v0  ;;  %v1102_v34 = vcombine.high %v1092_v12, %v1948_v0 }
 0x20c   : > { %v981_v40 = vcombine.high %v2507_v44, %v1948_v0  ;;  %v1218_v35 = vcombine.high %v1208_v36, %v1948_v0  ;;  %v1269_v28 = vcombine.high %v2483_v25, %v2500_v41 }
 0x20d   : > { %v753_v51 = vpop.permute.xlu1 %752 }
 0x20e   : > { %v385_v50 = vpop.permute.xlu0 %384  ;;  %v779_v2 = vsel %vm411_vm10, %v2331_v17, %v753_v51  ;;  %v980_v17 = vcombine.high %v962_v22, %v1948_v0 }
 0x20f   : > { %996 = vrot.lane.b32.xlu1 %v2507_v44, %s1959_s22  ;;  %872 = vrot.lane.b32.xlu0 %v846_v49, %s1957_s21  ;;  %v412_v20 = vsel %vm411_vm10, %v2326_v16, %v385_v50  ;;  %v964_v44 = vcombine.high %v2475_v19, %v2471_v18  ;;  %v1099_v18 = vrot.slane %v1085_v53, %v2321_v14 }
 0x210   : > { %v1285_v53 = vcombine.high %v2485_v26, %v2502_v42 }
 0x211   : > { %v757_v59 = vpop.permute.xlu1 %756  ;;  %v978_v63 = vrot.slane %v964_v44, %v2321_v14 }
 0x212   : > { %v389_v58 = vpop.permute.xlu0 %388  ;;  %v780_v61 = vsel %vm413_vm11, %v779_v2, %v757_v59 }
 0x213   : > { %984 = vrot.lane.b32.xlu1 %v979_v52, %s1956_s6  ;;  %880 = vrot.lane.b32.xlu0 %v855_v56, %s1959_s22  ;;  %v414_v24 = vsel %vm413_vm11, %v412_v20, %v389_v58  ;;  %v1268_v52 = vcombine.low %v2483_v25, %v2500_v41  ;;  %v1284_v56 = vcombine.low %v2485_v26, %v2502_v42 }
 0x214   : > { %v862_v58 = vrot.slane %v848_v43, %v2321_v14  ;;  %v1283_v25 = vrot.slane %v1269_v28, %v2303_v3  ;;  %v1299_v41 = vrot.slane %v1285_v53, %v2303_v3 }
 0x215   : > { %v761_v6 = vpop.permute.xlu1 %760  ;;  %v1292_v2 = vrot.slane %v1284_v56, %v2303_v3 }
 0x216   : > { %v393_v5 = vpop.permute.xlu0 %392  ;;  %v781_v11 = vsel %vm415_vm12, %v780_v61, %v761_v6  ;;  %v866_v61 = vcombine.high %v862_v58, %v1948_v0 }
 0x217   : > { %1221 = vrot.lane.b32.xlu1 %v1216_v1, %s1956_s6  ;;  %868 = vrot.lane.b32.xlu0 %v863_v4, %s1956_s6  ;;  %v416_v33 = vsel %vm415_vm12, %v414_v24, %v393_v5  ;;  %v1276_v1 = vrot.slane %v1268_v52, %v2303_v3  ;;  %v1317_v3 = vcombine.high %v1283_v25, %v1299_v41 }
 0x219   : > { %v765_v10 = vpop.permute.xlu1 %764  ;;  %v1300_v6 = vcombine.low %v1276_v1, %v1292_v2  ;;  %v1301_v26 = vcombine.high %v1276_v1, %v1292_v2 }
 0x21a   : > { %v397_v9 = vpop.permute.xlu0 %396  ;;  %v782_v22 = vsel %vm417_vm13, %v781_v11, %v765_v10  ;;  %v1316_v10 = vcombine.low %v1283_v25, %v1299_v41 }
 0x21b   : > { %992 = vrot.lane.b32.xlu1 %v980_v17, %s1958_s8  ;;  %876 = vrot.lane.b32.xlu0 %v864_v8, %s1958_s8  ;;  %v418_v46 = vsel %vm417_vm13, %v416_v33, %v397_v9  ;;  %v1103_v17 = vcombine.high %v1099_v18, %v1948_v0  ;;  %v982_v8 = vcombine.high %v978_v63, %v1948_v0 }
 0x21c   : > { %v2625_v42 = vrot.slane %v1300_v6, %v2321_v14  ;;  %v1219_v9 = vcombine.high %v1215_v27, %v1948_v0 }
 0x21d   : > { %v769_v23 = vpop.permute.xlu1 %768 }
 0x21e   : > { %v401_v21 = vpop.permute.xlu0 %400  ;;  %v783_v29 = vsel %vm419_vm14, %v782_v22, %v769_v23  ;;  %v1332_v11 = vcombine.high %v2625_v42, %v1948_v0 }
 0x21f   : > { %1229 = vrot.lane.b32.xlu1 %v1217_v15, %s1958_s8  ;;  %1117 = vrot.lane.b32.xlu0 %v1092_v12, %s1959_s22  ;;  %v420_v37 = vsel %vm419_vm14, %v418_v46, %v401_v21  ;;  %v1315_v12 = vrot.slane %v1301_v26, %v2321_v14  ;;  %v1324_v15 = vrot.slane %v1316_v10, %v2321_v14 }
 0x220   : > { %v1331_v21 = vrot.slane %v1317_v3, %v2321_v14 }
 0x221   : > { %v773_v16 = vpop.permute.xlu1 %772  ;;  %v1333_v13 = vcombine.high %v1315_v12, %v1948_v0  ;;  %v1334_v20 = vcombine.high %v1324_v15, %v1948_v0 }
 0x222   : > { %v1106_v32 = vpop.permute.xlu0 %1105  ;;  %v784_v38 = vsel %vm421_vm15, %v783_v29, %v773_v16  ;;  %v1335_v22 = vcombine.high %v1331_v21, %v1948_v0 }
 0x223   : > { %1233 = vrot.lane.b32.xlu1 %v1208_v36, %s1959_s22  ;;  %884 = vrot.lane.b32.xlu0 %v865_v30, %s1960_s27  ;;  %v1132_v51 = vsel %vm411_vm10, %v2378_v48, %v1106_v32 }
 0x225   : > { %v777_v49 = vpop.permute.xlu1 %776 }
 0x226   : > { %v405_v47 = vpop.permute.xlu0 %404  ;;  %v785_v50 = vsel %vm423_vm0, %v784_v38, %v777_v49 }
 0x227   : > { %1000 = vrot.lane.b32.xlu1 %v981_v40, %s1960_s27  ;;  %1121 = vrot.lane.b32.xlu0 %v1102_v34, %s1960_s27  ;;  %786 = vst [vmem:[#allocation3 + $0xc] sm:$0xf] %v785_v50  ;;  %v422_v19 = vsel %vm421_vm15, %v420_v37, %v405_v47 }
 0x22a   : > { %v1110_v59 = vpop.permute.xlu0 %1109 }
 0x22b   : > { %1237 = vrot.lane.b32.xlu1 %v1218_v35, %s1960_s27  ;;  %v1133_v48 = vsel %vm413_vm11, %v1132_v51, %v1110_v59  ;;  %888 = vrot.lane.b32.xlu0 %v862_v58, %s1961_s23 }
 0x22e   : > { %v409_v4 = vpop.permute.xlu0 %408 }
 0x22f   : > { %1004 = vrot.lane.b32.xlu1 %v978_v63, %s1961_s23  ;;  %v424_v5 = vsel %vm423_vm0, %v422_v19, %v409_v4  ;;  %1125 = vrot.lane.b32.xlu0 %v1099_v18, %s1961_s23 }
 0x230   : > { %425 = vst [vmem:[#allocation3] sm:$0xf] %v424_v5 }
 0x232   : > { %v1114_v62 = vpop.permute.xlu0 %1113 }
 0x233   : > { %1241 = vrot.lane.b32.xlu1 %v1215_v27, %s1961_s23  ;;  %v2617_v7 = vsel %vm415_vm12, %v1133_v48, %v1114_v62  ;;  %892 = vrot.lane.b32.xlu0 %v866_v61, %s1962_s4 }
 0x237   : > { %1008 = vrot.lane.b32.xlu1 %v982_v8, %s1962_s4  ;;  %1129 = vrot.lane.b32.xlu0 %v1103_v17, %s1962_s4 }
 0x23b   : > { %1245 = vrot.lane.b32.xlu1 %v1219_v9, %s1962_s4  ;;  %1337 = vrot.lane.b32.xlu0 %v1332_v11, %s1956_s6  ;;  %s2709_s6 = scalar_lea.hbm %s2777_s2, %s1597_s20 }
 0x23f   : > { %1341 = vrot.lane.b32.xlu1 %v1315_v12, %s1957_s21  ;;  %1345 = vrot.lane.b32.xlu0 %v1333_v13, %s1958_s8  ;;  %s1965_s21 = smov [#allocation9]  }
 0x240   : > { %s1820_s8 = sshll.u32 %s1965_s21, 4  ;;  %s1821_s8 = int_to_ptr.vmem [resolvable:$false] %s1820_s8 }
 0x241   : > { %p1823_p10 = scmp.lt.s32.totalorder %s2711_s29, %s1821_s8 }
 0x243   : > { %1349 = vrot.lane.b32.xlu1 %v1324_v15, %s1959_s22  ;;  %1353 = vrot.lane.b32.xlu0 %v1334_v20, %s1960_s27  ;;  %s1822_s22 = scalar_lea.vmem %s1821_s8, 256 }
 0x244   : > { %p1824_p0 = scmp.lt.s32.totalorder %s1822_s22, %s1816_s15 }
 0x246   : > { %p1825_p8 = por %p1824_p0, %p1823_p10 }
 0x247   : > { %1357 = vrot.lane.b32.xlu1 %v1331_v21, %s1961_s23  ;;  %1361 = vrot.lane.b32.xlu0 %v1335_v22, %s1962_s4 }
 0x248   : > { %p1826_p11 = pnand %p1825_p8, %p1819_p6 }
 0x25d   : > { %v516_v23 = vpop.permute.xlu1 %515 }
 0x261   : > { %v524_v24 = vpop.permute.xlu1 %523 }
 0x265   : > { %v532_v36 = vpop.permute.xlu1 %531  ;;  %v632_v29 = vpop.permute.xlu0 %631 }
 0x269   : > { %v512_v30 = vpop.permute.xlu1 %511  ;;  %v640_v32 = vpop.permute.xlu0 %639 }
 0x26a   : > { %v538_v14 = vsel %vm411_vm10, %v2420_v39, %v512_v30 }
 0x26b   : > { %v539_v16 = vsel %vm413_vm11, %v538_v14, %v516_v23 }
 0x26d   : > { %v520_v33 = vpop.permute.xlu1 %519  ;;  %v648_v38 = vpop.permute.xlu0 %647 }
 0x26e   : > { %v540_v34 = vsel %vm415_vm12, %v539_v16, %v520_v33 }
 0x26f   : > { %v541_v40 = vsel %vm417_vm13, %v540_v34, %v524_v24 }
 0x271   : > { %v528_v43 = vpop.permute.xlu1 %527  ;;  %v628_v47 = vpop.permute.xlu0 %627 }
 0x272   : > { %v542_v46 = vsel %vm419_vm14, %v541_v40, %v528_v43  ;;  %v654_v49 = vsel %vm411_vm10, %v2436_v55, %v628_v47 }
 0x273   : > { %v543_v50 = vsel %vm421_vm15, %v542_v46, %v532_v36  ;;  %v655_v44 = vsel %vm413_vm11, %v654_v49, %v632_v29 }
 0x275   : > { %v536_v51 = vpop.permute.xlu1 %535  ;;  %v636_v35 = vpop.permute.xlu0 %635 }
 0x276   : > { %v544_v39 = vsel %vm423_vm0, %v543_v50, %v536_v51  ;;  %v656_v37 = vsel %vm415_vm12, %v655_v44, %v636_v35 }
 0x277   : > { %545 = vst [vmem:[#allocation3 + $0x4] sm:$0xf] %v544_v39  ;;  %v657_v56 = vsel %vm417_vm13, %v656_v37, %v640_v32 }
 0x279   : > { %v989_v52 = vpop.permute.xlu1 %988  ;;  %v644_v58 = vpop.permute.xlu0 %643 }
 0x27a   : > { %v658_v59 = vsel %vm419_vm14, %v657_v56, %v644_v58 }
 0x27b   : > { %v659_v55 = vsel %vm421_vm15, %v658_v59, %v648_v38 }
 0x27d   : > { %v1226_v48 = vpop.permute.xlu1 %1225  ;;  %v652_v18 = vpop.permute.xlu0 %651 }
 0x27e   : > { %v660_v19 = vsel %vm423_vm0, %v659_v55, %v652_v18  ;;  %v1373_v4 = vld [vmem:[#allocation3] sm:$0xff] }
 0x27f   : > { %661 = vst [vmem:[#allocation3 + $0x8] sm:$0xf] %v660_v19 }
 0x281   : > { %v997_v60 = vpop.permute.xlu1 %996  ;;  %v873_v63 = vpop.permute.xlu0 %872 }
 0x285   : > { %v985_v1 = vpop.permute.xlu1 %984  ;;  %v881_v2 = vpop.permute.xlu0 %880 }
 0x286   : > { %v1374_v5 = vld [vmem:[#allocation3 + $0x8] sm:$0xff]  ;;  %v1011_v12 = vsel %vm411_vm10, %v2510_v45, %v985_v1 }
 0x287   : > { %v1621_v27 = vpack.c.bf16 %v1374_v5, %v1373_v4  ;;  %v1012_v20 = vsel %vm413_vm11, %v1011_v12, %v989_v52  ;;  %v1372_v5 = vld [vmem:[#allocation7] sm:$0xff] }
 0x289   : > { %v1222_v28 = vpop.permute.xlu1 %1221  ;;  %1622 = vmatpush3.bf16.msra.mxu0 %v1621_v27  ;;  %v869_v53 = vpop.permute.xlu0 %868 }
 0x28a   : > { %1623 = vmatprep.subr.bf16.mxu0 %v1963_v31  ;;  %v895_v9 = vsel %vm411_vm10, %v2525_v57, %v869_v53  ;;  %v1248_v24 = vsel %vm411_vm10, %v2521_v54, %v1222_v28 }
 0x28b   : > { %v896_v3 = vsel %vm413_vm11, %v895_v9, %v873_v63  ;;  %v1249_v16 = vsel %vm413_vm11, %v1248_v24, %v1226_v48 }
 0x28d   : > { %v993_v6 = vpop.permute.xlu1 %992  ;;  %v877_v61 = vpop.permute.xlu0 %876 }
 0x28e   : > { %v897_v31 = vsel %vm415_vm12, %v896_v3, %v877_v61  ;;  %v1013_v21 = vsel %vm415_vm12, %v1012_v20, %v993_v6 }
 0x28f   : > { %v898_v22 = vsel %vm417_vm13, %v897_v31, %v881_v2  ;;  %v1014_v29 = vsel %vm417_vm13, %v1013_v21, %v997_v60 }
 0x291   : > { %v1230_v62 = vpop.permute.xlu1 %1229  ;;  %v1118_v17 = vpop.permute.xlu0 %1117 }
 0x292   : > { %v1135_v14 = vsel %vm417_vm13, %v2617_v7, %v1118_v17  ;;  %v1250_v38 = vsel %vm415_vm12, %v1249_v16, %v1230_v62 }
 0x295   : > { %v1234_v8 = vpop.permute.xlu1 %1233  ;;  %v885_v25 = vpop.permute.xlu0 %884 }
 0x296   : > { %v899_v23 = vsel %vm419_vm14, %v898_v22, %v885_v25  ;;  %v1251_v47 = vsel %vm417_vm13, %v1250_v38, %v1234_v8 }
 0x299   : > { %v1001_v41 = vpop.permute.xlu1 %1000  ;;  %v1122_v26 = vpop.permute.xlu0 %1121 }
 0x29a   : > { %v1015_v32 = vsel %vm419_vm14, %v1014_v29, %v1001_v41  ;;  %v1136_v33 = vsel %vm419_vm14, %v1135_v14, %v1122_v26 }
 0x29d   : > { %v1238_v10 = vpop.permute.xlu1 %1237  ;;  %v889_v11 = vpop.permute.xlu0 %888 }
 0x29e   : > { %v900_v45 = vsel %vm421_vm15, %v899_v23, %v889_v11  ;;  %v1252_v49 = vsel %vm419_vm14, %v1251_v47, %v1238_v10 }
 0x2a1   : > { %v1005_v13 = vpop.permute.xlu1 %1004  ;;  %v1126_v15 = vpop.permute.xlu0 %1125 }
 0x2a2   : > { %v1016_v34 = vsel %vm421_vm15, %v1015_v32, %v1005_v13  ;;  %v1137_v40 = vsel %vm421_vm15, %v1136_v33, %v1126_v15 }
 0x2a5   : > { %v1242_v57 = vpop.permute.xlu1 %1241  ;;  %v893_v36 = vpop.permute.xlu0 %892 }
 0x2a6   : > { %v901_v30 = vsel %vm423_vm0, %v900_v45, %v893_v36  ;;  %v1253_v50 = vsel %vm421_vm15, %v1252_v49, %v1242_v57 }
 0x2a7   : > { %902 = vst [vmem:[#allocation3 + $0x10] sm:$0xf] %v901_v30 }
 0x2a9   : > { %v1009_v54 = vpop.permute.xlu1 %1008  ;;  %v1130_v46 = vpop.permute.xlu0 %1129 }
 0x2aa   : > { %v1017_v43 = vsel %vm423_vm0, %v1016_v34, %v1009_v54  ;;  %v1138_v7 = vsel %vm423_vm0, %v1137_v40, %v1130_v46 }
 0x2ab   : > { %1018 = vst [vmem:[#allocation3 + $0x14] sm:$0xf] %v1017_v43  ;;  %1139 = vst [vmem:[#allocation3 + $0x18] sm:$0xf] %v1138_v7 }
 0x2ad   : > { %v1246_v51 = vpop.permute.xlu1 %1245  ;;  %v1338_v44 = vpop.permute.xlu0 %1337 }
 0x2ae   : > { %v1254_v39 = vsel %vm423_vm0, %v1253_v50, %v1246_v51  ;;  %v1364_v35 = vsel %vm411_vm10, %v2625_v42, %v1338_v44 }
 0x2af   : > { %1255 = vst [vmem:[#allocation3 + $0x1c] sm:$0xf] %v1254_v39 }
 0x2b1   : > { %v1342_v37 = vpop.permute.xlu1 %1341  ;;  %v1346_v56 = vpop.permute.xlu0 %1345 }
 0x2b2   : > { %v1365_v52 = vsel %vm413_vm11, %v1364_v35, %v1342_v37  ;;  %v1375_v18 = vld [vmem:[#allocation3 + $0x10] sm:$0xff] }
 0x2b3   : > { %v1366_v58 = vsel %vm415_vm12, %v1365_v52, %v1346_v56 }
 0x2b5   : > { %v1350_v59 = vpop.permute.xlu1 %1349  ;;  %v1354_v55 = vpop.permute.xlu0 %1353 }
 0x2b6   : > { %v1367_v48 = vsel %vm417_vm13, %v1366_v58, %v1350_v59  ;;  %v1376_v19 = vld [vmem:[#allocation3 + $0x18] sm:$0xff] }
 0x2b7   : > { %v1624_v60 = vpack.c.bf16 %v1376_v19, %v1375_v18  ;;  %v1368_v63 = vsel %vm419_vm14, %v1367_v48, %v1354_v55 }
 0x2b9   : > { %v1358_v1 = vpop.permute.xlu1 %1357  ;;  %1625 = vmatpush3.bf16.msra.mxu0 %v1624_v60  ;;  %v1362_v2 = vpop.permute.xlu0 %1361 }
 0x2ba   : > { %v1369_v42 = vsel %vm421_vm15, %v1368_v63, %v1358_v1  ;;  %1615 = vmatprep.subr.mxu0 %v1948_v0 }
 0x2bb   : > { %v1370_v4 = vsel %vm423_vm0, %v1369_v42, %v1362_v2 }
 0x2bc   : > { %1371 = vst [vmem:[#allocation3 + $0x20] sm:$0xf] %v1370_v4 }
 0x2c3   : > { %v1377_v27 = vld [vmem:[#allocation3 + $0x20] sm:$0xf] }
 0x2c4   : > { %1616 = vmatpush3.msk.msra.mxu0 %vm1382_vm2, %v1377_v27 }
 0x2c5   : > { %1618 = vmatmul.mubr.msk.f32.vlgmr.msra.gmra.mrb[0].mxu0 %vm1378_vm3, %v1372_v5 }
 0x398   : > { %v1452_v0 = vpop.f32.mrb[0].mxu0 }
 0x399   : > { %1456 = vst [vmem:[%s188_s12] sm:$0xff] %v1452_v0  ;;  %v1619_v28 = vpop.f32.mrb[1].mxu0 }
 0x39a   : > { %1829 = shalt.err (!%p1826_p11)
}
 0x39b   : > { %s1830_s25 = scalar_lea.hbm %s2709_s6, 128  ;;  %s1834_s27 = scalar_lea.hbm %s2777_s2, 512 }
 0x39c   : > { %p1831_p13 = scmp.ne.s32.totalorder %s2709_s6, %s1830_s25  ;;  %p1835_p1 = scmp.lt.u32.totalorder %s2709_s6, %s2777_s2 }
 0x39d   : > { %p1836_p5 = scmp.lt.u32.totalorder %s1834_s27, %s1830_s25  ;;  %p1838_p2 = scmp.lt.u32.totalorder %s1830_s25, %s2709_s6 }
 0x39e   : > { %p1832_p7 = pnand %p1831_p13, %p2805_p12 }
 0x39f   : > { %p1837_p4 = por %p1836_p5, %p1835_p1 }
 0x3a0   : > { %p1833_p9 = pneg %p1832_p7 }
 0x3a1   : > { %p1839_p3 = por %p1838_p2, %p1837_p4 }
 0x3a3   : > { %p1840_p6 = pnand %p1839_p3, %p1833_p9 }
 0x3a5   : > { %1843 = shalt.err (!%p1840_p6)
}
 0x3a6   : > { %1632 = dma.vmem_to_hbm [thread:$0]  (%p2805_p12), %s2711_s29, 128, %s2709_s6, %s1458_s16  }
 0x3a7 PF: > { %s2806_s24 = sld [smem:[#allocation14_spill]]  ;;  %p1649_p10 = scmp.ge.s32.totalorder %s1942_s19, 2 }
 0x3a8   : > { %s1485_s3 = sand.u32 1, %s1902_s9  }
 0x3a9   : > { %s1486_s20 = scalar_lea.sflag [#allocation6], %s1485_s3 }
 0x3ad   : > { %p2807_p0 = scmp.ne.s32.totalorder %s2806_s24, 0 }
 0x3af   : > { %p1643_p8 = pnand %p1649_p10, %p2807_p0 }
 0x3b1   : > { %1897 = dma.done.wait (!%p1643_p8), %s1486_s20, 128  }
 0x3b2   : > { %1899 = vsyncadd (!%p1643_p8), %s1486_s20, 4294967168  ;;  %s19_s19 = sadd.s32 1, %s1942_s19   ;;  %s2808_s15 = sld [smem:[#allocation13_spill]] }
 0x3b3   : > { %p16_p11 = scmp.ge.s32.totalorder %s19_s19, 6   ;;  %s2809_s26 = sld [smem:[#allocation15_spill]] }
 0x3b4   : > { %s2810_s9 = smov %s1906_s10  ;;  %s2811_s10 = smov %s1910_s11 }
 0x3b5   : > { %s2812_s11 = smov %s2131_s17  ;;  %s2813_s12 = smov %s1918_s13 }
 0x3b6   : > { %s2814_s13 = smov %s1922_s14  ;;  %s2815_s14 = smov %s2128_s30 }
 0x3b7   : > { %s2816_s16 = smov %s1938_s18  ;;  %s2818_s18 = smov %s2824_s7 }
 0x3b8   :  { %18 = sbr.rel (!%p16_p11) target bundleno = 12 (0xc), region = 88 }
 0x3b9   : > { %s2817_s17 = smov %s2809_s26 }
 0x3bf   :  { %1491 = vsyncpa [#allocation5], 1 }
 0x3c0   :  { %1493 = vsyncpa [#allocation5 + $0x1], 1 }
 0x3c1   :  { %1494 = vsyncpa [#allocation8], 1 }
 0x3c2   :  { %1495 = vsyncpa [#allocation6], 1 }
 0x3c3   :  { %1497 = vsyncpa [#allocation6 + $0x1], 1 }

</bundles_post_ra>
